<compile_context>
chip_gen: v6e
topology: v6e:2x2x1
jax: 0.10.0
libtpu: 0.0.40
codegen_flags: <defaults>
</compile_context>

<pallas_src>
import jax
import jax.numpy as jnp
from jax.experimental import pallas as pl
from jax.experimental.pallas import tpu as pltpu

LANE = 128             # lane width of a vreg
SUBLANE = 8            # sublane count of a vreg
MAX_TILE_ROWS = 1024   # (1024, 128) f32 tile = 512 KiB


def scale_bias_kernel(x_ref, w_ref, b_ref, o_ref):
    # x_ref/o_ref: (tile_rows, LANE) VMEM tiles; w_ref/b_ref: (1, 1) SMEM scalars.
    w = w_ref[0, 0]
    b = b_ref[0, 0]
    o_ref[...] = x_ref[...] * w + b


def _regnn_forward_impl(x, weight, bias):
    n, in_f = x.shape
    out_f, _ = weight.shape
    assert in_f == 1 and out_f == 1, "RegNN is a 1-in / 1-out linear layer"

    # Repack (N, 1) -> lane-dense (rows, 128); rows is a multiple of 8 and of
    # the tile size so the grid tiles evenly and blocks satisfy (8, 128).
    rows = max(pl.cdiv(n, LANE), SUBLANE)
    rows = pl.cdiv(rows, SUBLANE) * SUBLANE
    tile_rows = min(MAX_TILE_ROWS, rows)
    rows = pl.cdiv(rows, tile_rows) * tile_rows
    padded_len = rows * LANE

    flat = jnp.pad(x.reshape(-1), (0, padded_len - n))
    x2d = flat.reshape(rows, LANE)

    w_s = weight.reshape(1, 1)
    b_s = bias.reshape(1, 1)

    grid = (rows // tile_rows,)
    y2d = pl.pallas_call(
        scale_bias_kernel,
        out_shape=jax.ShapeDtypeStruct((rows, LANE), x.dtype),
        grid=grid,
        in_specs=[
            pl.BlockSpec((tile_rows, LANE), lambda i: (i, 0)),
            pl.BlockSpec(memory_space=pltpu.MemorySpace.SMEM),  # weight scalar
            pl.BlockSpec(memory_space=pltpu.MemorySpace.SMEM),  # bias scalar
        ],
        out_specs=pl.BlockSpec((tile_rows, LANE), lambda i: (i, 0)),
        compiler_params=pltpu.CompilerParams(
            dimension_semantics=("parallel",),
        ),
    )(x2d, w_s, b_s)

    # Unpack back to (N, 1).
    return y2d.reshape(-1)[:n].reshape(n, out_f)


# Jit so padding/reshape/slice fuse with the pallas_call instead of running as
# separate un-pipelined ops.
regnn_forward = jax.jit(_regnn_forward_impl)


if __name__ == "__main__":
    key = jax.random.PRNGKey(0)
    k_x, k_w, k_b = jax.random.split(key, 3)

    # nn.Linear(1, 1): weight (1, 1), bias (1,); PyTorch init is U(-1, 1) for fan_in=1.
    weight = jax.random.uniform(k_w, (1, 1), jnp.float32, minval=-1.0, maxval=1.0)
    bias = jax.random.uniform(k_b, (1,), jnp.float32, minval=-1.0, maxval=1.0)

    # Small batch of column-vector inputs, matching the (N, 1) layout of the spec.
    x = jax.random.normal(k_x, (8, 1), jnp.float32)
    y = regnn_forward(x, weight, bias)
    jax.block_until_ready(y)
    y_ref = x @ weight.T + bias.reshape(1, 1)
    assert y.shape == y_ref.shape, (y.shape, y_ref.shape)
    assert jnp.allclose(y, y_ref, atol=1e-6), (y, y_ref)

    # Also cover the spec's exact input shape (1, 1): x = linspace(1, 1, 1).view(-1, 1)
    x1 = jnp.ones((1, 1), jnp.float32)
    y1 = regnn_forward(x1, weight, bias)
    jax.block_until_ready(y1)
    y1_ref = x1 @ weight.T + bias.reshape(1, 1)
    assert y1.shape == y1_ref.shape, (y1.shape, y1_ref.shape)
    assert jnp.allclose(y1, y1_ref, atol=1e-6), (y1, y1_ref)

    print("KERNEL_OK")
</pallas_src>

<mosaic_0001>
module attributes {stable_mosaic.version = 11 : i64} {
  func.func @scale_bias_kernel(%arg0: i32, %arg1: memref<8x128xf32, #tpu.memory_space<vmem>>, %arg2: memref<1x1xf32, #tpu.memory_space<smem>>, %arg3: memref<1x1xf32, #tpu.memory_space<smem>>, %arg4: memref<8x128xf32, #tpu.memory_space<vmem>>) attributes {dimension_semantics = [#tpu.dimension_semantics<parallel>], iteration_bounds = array<i64: 1>, scalar_prefetch = 0 : i64, scratch_operands = 0 : i64, tpu.core_type = #tpu.core_type<tc>, window_params = [{transform_indices = @transform_0, window_bounds = array<i64: 8, 128>}, {transform_indices = @transform_1, window_bounds = array<i64: 1, 1>}, {transform_indices = @transform_2, window_bounds = array<i64: 1, 1>}, {transform_indices = @transform_3, window_bounds = array<i64: 8, 128>}]} {
    %c0 = arith.constant 0 : index
    %c0_0 = arith.constant 0 : index
    %0 = memref.load %arg2[%c0, %c0_0] : memref<1x1xf32, #tpu.memory_space<smem>>
    %c0_1 = arith.constant 0 : index
    %c0_2 = arith.constant 0 : index
    %1 = memref.load %arg3[%c0_1, %c0_2] : memref<1x1xf32, #tpu.memory_space<smem>>
    %c0_3 = arith.constant 0 : index
    %c0_4 = arith.constant 0 : index
    %2 = vector.load %arg1[%c0_3, %c0_4] : memref<8x128xf32, #tpu.memory_space<vmem>>, vector<8x128xf32>
    %3 = vector.broadcast %0 : f32 to vector<8x128xf32>
    %4 = arith.mulf %2, %3 : vector<8x128xf32>
    %5 = vector.broadcast %1 : f32 to vector<8x128xf32>
    %6 = arith.addf %4, %5 : vector<8x128xf32>
    %c0_5 = arith.constant 0 : index
    %c0_6 = arith.constant 0 : index
    %7 = vector.load %arg4[%c0_5, %c0_6] : memref<8x128xf32, #tpu.memory_space<vmem>>, vector<8x128xf32>
    tpu.vector_store %arg4[%c0_5, %c0_6], %6 {strides = array<i32>} : memref<8x128xf32, #tpu.memory_space<vmem>>, vector<8x128xf32>,
    return
  }
  func.func @transform_0(%arg0: i32) -> (i32, i32) {
    %c0_i32 = arith.constant 0 : i32
    %c0_i32_0 = arith.constant 0 : i32
    return %arg0, %c0_i32 : i32, i32
  }
  func.func @transform_1(%arg0: i32) -> (i32, i32) {
    %c0_i32 = arith.constant 0 : i32
    %c0_i32_0 = arith.constant 0 : i32
    %c0_i32_1 = arith.constant 0 : i32
    return %c0_i32, %c0_i32_0 : i32, i32
  }
  func.func @transform_2(%arg0: i32) -> (i32, i32) {
    %c0_i32 = arith.constant 0 : i32
    %c0_i32_0 = arith.constant 0 : i32
    %c0_i32_1 = arith.constant 0 : i32
    return %c0_i32, %c0_i32_0 : i32, i32
  }
  func.func @transform_3(%arg0: i32) -> (i32, i32) {
    %c0_i32 = arith.constant 0 : i32
    %c0_i32_0 = arith.constant 0 : i32
    return %arg0, %c0_i32 : i32, i32
  }
}

</mosaic_0001>

<bundles_post_ra>
// kernel: _regnn_forward_impl.1
= control target key start
LH: loop header
LB: loop body
LE: loop exit
PB: predicated region body
PF: predicated region fallthrough
CT: control target
= control target key end

     0   :  { %s60_s0 = inlined_call_operand.vmem [shape: f32[8,128], index: 0, kind: input, shape index: {}]   ;;  %s61_s1 = inlined_call_operand.<no memory space> [shape: f32[1,1], index: 1, kind: input, shape index: {}]   ;;  %s62_s2 = inlined_call_operand.<no memory space> [shape: f32[1,1], index: 2, kind: input, shape index: {}]   ;;  %s63_s3 = inlined_call_operand.vmem [shape: f32[8,128], index: 3, kind: output, shape index: {}]  }
   0x1   :  { %v18_v0 = vld [vmem:[%s60_s0] sm:$0xff]  ;;  %v19_v1 = vstv %s61_s1  ;;  %v21_v2 = vstv %s62_s2 }
   0x2   :  { %v20_v3 = vmul.f32 %v19_v1, %v18_v0 }
   0x4   :  { %v22_v4 = vadd.f32 %v21_v2, %v20_v3 }
   0x6   :  { %23 = vst [vmem:[%s63_s3] sm:$0xff] %v22_v4 }

</bundles_post_ra>
